<compile_context>
chip_gen: v7x
topology: tpu7x:2x2x1
jax: 0.10.0
libtpu: 0.0.40
codegen_flags: <defaults>
</compile_context>

<pallas_src>
import functools

import jax
import jax.numpy as jnp
from jax.experimental import pallas as pl
from jax.experimental.pallas import tpu as pltpu

BLOCK_SIZE = 24
COLUMNS = 20
IN_FEATURES = BLOCK_SIZE * COLUMNS      # 480
F_PAD = 512                             # feature axis padded to lane multiple
H1, H2, H3, OUT = 256, 128, 64, 1
OUT_PAD = 128                           # lane-padded final layer width
DEFAULT_TILE_B = 1024                   # ~1 MiB bf16 x-tile; fits v5e/v6e/v7x VMEM


def _round_up(x, m):
    return (x + m - 1) // m * m


def _mlp_kernel(x_ref, w1_ref, b1_ref, w2_ref, b2_ref, w3_ref, b3_ref,
                w4_ref, b4_ref, o_ref):
    x = x_ref[...]                                                    # (TB, 512) bf16
    h = jnp.dot(x, w1_ref[...], preferred_element_type=jnp.float32)  # (TB, 256) f32
    h = jnp.maximum(h + b1_ref[...], 0.0)
    h = jnp.dot(h.astype(jnp.bfloat16), w2_ref[...],
                preferred_element_type=jnp.float32)                   # (TB, 128)
    h = jnp.maximum(h + b2_ref[...], 0.0)
    h = jnp.dot(h.astype(jnp.bfloat16), w3_ref[...],
                preferred_element_type=jnp.float32)                   # (TB, 64)
    h = jnp.maximum(h + b3_ref[...], 0.0)
    logits = jnp.dot(h.astype(jnp.bfloat16), w4_ref[...],
                     preferred_element_type=jnp.float32)              # (TB, 128) padded
    logits = logits + b4_ref[...]
    # Only the first column is real; sigmoid (EUP) on it and store (TB, 1).
    o_ref[...] = jax.nn.sigmoid(logits[:, :OUT])


def prepare_params(params):
    """One-time packing: pad K 480->512, pad final layer to 128 lanes, cast
    weights to bf16 (biases stay f32, shaped (1, H) for broadcast adds)."""
    w1, b1, w2, b2, w3, b3, w4, b4 = params
    w1p = jnp.zeros((F_PAD, H1), jnp.float32).at[:IN_FEATURES, :].set(w1)
    w4p = jnp.zeros((H3, OUT_PAD), jnp.float32).at[:, :OUT].set(w4)
    b4p = jnp.zeros((1, OUT_PAD), jnp.float32).at[:, :OUT].set(b4)
    return (
        w1p.astype(jnp.bfloat16), b1.reshape(1, -1).astype(jnp.float32),
        w2.astype(jnp.bfloat16), b2.reshape(1, -1).astype(jnp.float32),
        w3.astype(jnp.bfloat16), b3.reshape(1, -1).astype(jnp.float32),
        w4p.astype(jnp.bfloat16), b4p.astype(jnp.float32),
    )


@functools.partial(jax.jit, static_argnames=("tile_b",))
def mlp_forward(x, packed_params, *, tile_b=DEFAULT_TILE_B):
    """x: (B, 480) float32.  Returns (B, 1) float32 sigmoid outputs."""
    B = x.shape[0]
    TILE_B = min(tile_b, _round_up(max(B, 8), 8))
    Bp = _round_up(B, TILE_B)

    # Pad batch to a tile multiple and features 480 -> 512; cast to bf16.
    xp = jnp.pad(x.astype(jnp.bfloat16),
                 ((0, Bp - B), (0, F_PAD - IN_FEATURES)))

    w1p, b1, w2, b2, w3, b3, w4p, b4p = packed_params

    const = lambda i: (0, 0)  # weights/biases resident across batch tiles
    out = pl.pallas_call(
        _mlp_kernel,
        out_shape=jax.ShapeDtypeStruct((Bp, OUT), jnp.float32),
        grid=(Bp // TILE_B,),
        in_specs=[
            pl.BlockSpec((TILE_B, F_PAD), lambda i: (i, 0)),
            pl.BlockSpec((F_PAD, H1), const),
            pl.BlockSpec((1, H1), const),
            pl.BlockSpec((H1, H2), const),
            pl.BlockSpec((1, H2), const),
            pl.BlockSpec((H2, H3), const),
            pl.BlockSpec((1, H3), const),
            pl.BlockSpec((H3, OUT_PAD), const),
            pl.BlockSpec((1, OUT_PAD), const),
        ],
        out_specs=pl.BlockSpec((TILE_B, OUT), lambda i: (i, 0)),
        compiler_params=pltpu.CompilerParams(
            dimension_semantics=("parallel",)),
    )(xp, w1p, b1, w2, b2, w3, b3, w4p, b4p)
    return out[:B]


def init_params(key):
    """Kaiming-uniform-ish init matching PyTorch Linear shapes,
    stored transposed as (in_features, out_features)."""
    def linear(k, fan_in, fan_out):
        kw, kb = jax.random.split(k)
        bound = 1.0 / jnp.sqrt(fan_in)
        w = jax.random.uniform(kw, (fan_in, fan_out), jnp.float32, -bound, bound)
        b = jax.random.uniform(kb, (fan_out,), jnp.float32, -bound, bound)
        return w, b

    k1, k2, k3, k4 = jax.random.split(key, 4)
    w1, b1 = linear(k1, IN_FEATURES, H1)
    w2, b2 = linear(k2, H1, H2)
    w3, b3 = linear(k3, H2, H3)
    w4, b4 = linear(k4, H3, OUT)
    return (w1, b1, w2, b2, w3, b3, w4, b4)


def _reference(x, params):
    w1, b1, w2, b2, w3, b3, w4, b4 = params
    h = jnp.maximum(x @ w1 + b1, 0.0)
    h = jnp.maximum(h @ w2 + b2, 0.0)
    h = jnp.maximum(h @ w3 + b3, 0.0)
    return jax.nn.sigmoid(h @ w4 + b4)


if __name__ == "__main__":
    key = jax.random.PRNGKey(0)
    k_params, k_x, k_x2 = jax.random.split(key, 3)
    params = init_params(k_params)
    packed = prepare_params(params)

    # Small-batch check (B = 8), single grid step.
    x = jax.random.normal(k_x, (8, IN_FEATURES), jnp.float32)
    out = jax.block_until_ready(mlp_forward(x, packed))
    ref = _reference(x, params)
    assert out.shape == (8, 1)
    assert jnp.allclose(out, ref, atol=2e-2, rtol=0.0), \
        float(jnp.max(jnp.abs(out - ref)))

    # Multi-tile check with non-multiple batch (exercises grid + row padding).
    x2 = jax.random.normal(k_x2, (300, IN_FEATURES), jnp.float32)
    out2 = jax.block_until_ready(mlp_forward(x2, packed, tile_b=128))
    ref2 = _reference(x2, params)
    assert out2.shape == (300, 1)
    assert jnp.allclose(out2, ref2, atol=2e-2, rtol=0.0), \
        float(jnp.max(jnp.abs(out2 - ref2)))

    print("KERNEL_OK")
</pallas_src>

<mosaic_0001>
module attributes {stable_mosaic.version = 11 : i64} {
  func.func @_mlp_kernel(%arg0: i32, %arg1: memref<8x512xbf16, #tpu.memory_space<vmem>>, %arg2: memref<512x256xbf16, #tpu.memory_space<vmem>>, %arg3: memref<1x256xf32, #tpu.memory_space<vmem>>, %arg4: memref<256x128xbf16, #tpu.memory_space<vmem>>, %arg5: memref<1x128xf32, #tpu.memory_space<vmem>>, %arg6: memref<128x64xbf16, #tpu.memory_space<vmem>>, %arg7: memref<1x64xf32, #tpu.memory_space<vmem>>, %arg8: memref<64x128xbf16, #tpu.memory_space<vmem>>, %arg9: memref<1x128xf32, #tpu.memory_space<vmem>>, %arg10: memref<8x1xf32, #tpu.memory_space<vmem>>) attributes {dimension_semantics = [#tpu.dimension_semantics<parallel>], iteration_bounds = array<i64: 1>, scalar_prefetch = 0 : i64, scratch_operands = 0 : i64, tpu.core_type = #tpu.core_type<tc>, window_params = [{transform_indices = @transform_0, window_bounds = array<i64: 8, 512>}, {pipeline_mode = #tpu.pipeline_mode<synchronous>, transform_indices = @transform_1, window_bounds = array<i64: 512, 256>}, {pipeline_mode = #tpu.pipeline_mode<synchronous>, transform_indices = @transform_2, window_bounds = array<i64: 1, 256>}, {pipeline_mode = #tpu.pipeline_mode<synchronous>, transform_indices = @transform_3, window_bounds = array<i64: 256, 128>}, {pipeline_mode = #tpu.pipeline_mode<synchronous>, transform_indices = @transform_4, window_bounds = array<i64: 1, 128>}, {pipeline_mode = #tpu.pipeline_mode<synchronous>, transform_indices = @transform_5, window_bounds = array<i64: 128, 64>}, {pipeline_mode = #tpu.pipeline_mode<synchronous>, transform_indices = @transform_6, window_bounds = array<i64: 1, 64>}, {pipeline_mode = #tpu.pipeline_mode<synchronous>, transform_indices = @transform_7, window_bounds = array<i64: 64, 128>}, {pipeline_mode = #tpu.pipeline_mode<synchronous>, transform_indices = @transform_8, window_bounds = array<i64: 1, 128>}, {transform_indices = @transform_9, window_bounds = array<i64: 8, 1>}]} {
    %c0 = arith.constant 0 : index
    %c0_0 = arith.constant 0 : index
    %0 = vector.load %arg1[%c0, %c0_0] : memref<8x512xbf16, #tpu.memory_space<vmem>>, vector<8x512xbf16>
    %c0_1 = arith.constant 0 : index
    %c0_2 = arith.constant 0 : index
    %1 = vector.load %arg2[%c0_1, %c0_2] : memref<512x256xbf16, #tpu.memory_space<vmem>>, vector<512x256xbf16>
    %cst = arith.constant dense<0.000000e+00> : vector<8x256xf32>
    %2 = tpu.matmul %0, %1, %cst {dimension_numbers = #tpu.dot_dimension_numbers<[1], [0], [0], [1], [0, 0, 1, 1], [], []>} : vector<8x512xbf16>, vector<512x256xbf16>, vector<8x256xf32> -> vector<8x256xf32>
    %c0_3 = arith.constant 0 : index
    %c0_4 = arith.constant 0 : index
    %3 = vector.load %arg3[%c0_3, %c0_4] : memref<1x256xf32, #tpu.memory_space<vmem>>, vector<1x256xf32>
    %4 = vector.broadcast %3 : vector<1x256xf32> to vector<8x256xf32>
    %5 = arith.addf %2, %4 : vector<8x256xf32>
    %cst_5 = arith.constant 0.000000e+00 : f32
    %6 = vector.broadcast %cst_5 : f32 to vector<8x256xf32>
    %7 = arith.maximumf %5, %6 : vector<8x256xf32>
    %8 = arith.truncf %7 : vector<8x256xf32> to vector<8x256xbf16>
    %c0_6 = arith.constant 0 : index
    %c0_7 = arith.constant 0 : index
    %9 = vector.load %arg4[%c0_6, %c0_7] : memref<256x128xbf16, #tpu.memory_space<vmem>>, vector<256x128xbf16>
    %cst_8 = arith.constant dense<0.000000e+00> : vector<8x128xf32>
    %10 = tpu.matmul %8, %9, %cst_8 {dimension_numbers = #tpu.dot_dimension_numbers<[1], [0], [0], [1], [0, 0, 1, 1], [], []>} : vector<8x256xbf16>, vector<256x128xbf16>, vector<8x128xf32> -> vector<8x128xf32>
    %c0_9 = arith.constant 0 : index
    %c0_10 = arith.constant 0 : index
    %11 = vector.load %arg5[%c0_9, %c0_10] : memref<1x128xf32, #tpu.memory_space<vmem>>, vector<1x128xf32>
    %12 = vector.broadcast %11 : vector<1x128xf32> to vector<8x128xf32>
    %13 = arith.addf %10, %12 : vector<8x128xf32>
    %cst_11 = arith.constant 0.000000e+00 : f32
    %14 = vector.broadcast %cst_11 : f32 to vector<8x128xf32>
    %15 = arith.maximumf %13, %14 : vector<8x128xf32>
    %16 = arith.truncf %15 : vector<8x128xf32> to vector<8x128xbf16>
    %c0_12 = arith.constant 0 : index
    %c0_13 = arith.constant 0 : index
    %17 = vector.load %arg6[%c0_12, %c0_13] : memref<128x64xbf16, #tpu.memory_space<vmem>>, vector<128x64xbf16>
    %cst_14 = arith.constant dense<0.000000e+00> : vector<8x64xf32>
    %18 = tpu.matmul %16, %17, %cst_14 {dimension_numbers = #tpu.dot_dimension_numbers<[1], [0], [0], [1], [0, 0, 1, 1], [], []>} : vector<8x128xbf16>, vector<128x64xbf16>, vector<8x64xf32> -> vector<8x64xf32>
    %c0_15 = arith.constant 0 : index
    %c0_16 = arith.constant 0 : index
    %19 = vector.load %arg7[%c0_15, %c0_16] : memref<1x64xf32, #tpu.memory_space<vmem>>, vector<1x64xf32>
    %20 = vector.broadcast %19 : vector<1x64xf32> to vector<8x64xf32>
    %21 = arith.addf %18, %20 : vector<8x64xf32>
    %cst_17 = arith.constant 0.000000e+00 : f32
    %22 = vector.broadcast %cst_17 : f32 to vector<8x64xf32>
    %23 = arith.maximumf %21, %22 : vector<8x64xf32>
    %24 = arith.truncf %23 : vector<8x64xf32> to vector<8x64xbf16>
    %c0_18 = arith.constant 0 : index
    %c0_19 = arith.constant 0 : index
    %25 = vector.load %arg8[%c0_18, %c0_19] : memref<64x128xbf16, #tpu.memory_space<vmem>>, vector<64x128xbf16>
    %cst_20 = arith.constant dense<0.000000e+00> : vector<8x128xf32>
    %26 = tpu.matmul %24, %25, %cst_20 {dimension_numbers = #tpu.dot_dimension_numbers<[1], [0], [0], [1], [0, 0, 1, 1], [], []>} : vector<8x64xbf16>, vector<64x128xbf16>, vector<8x128xf32> -> vector<8x128xf32>
    %c0_21 = arith.constant 0 : index
    %c0_22 = arith.constant 0 : index
    %27 = vector.load %arg9[%c0_21, %c0_22] : memref<1x128xf32, #tpu.memory_space<vmem>>, vector<1x128xf32>
    %28 = vector.broadcast %27 : vector<1x128xf32> to vector<8x128xf32>
    %29 = arith.addf %26, %28 : vector<8x128xf32>
    %30 = vector.extract_strided_slice %29 {offsets = [0, 0], sizes = [8, 1], strides = [1, 1]} : vector<8x128xf32> to vector<8x1xf32>
    %31 = arith.negf %30 : vector<8x1xf32>
    %32 = math.exp %31 : vector<8x1xf32>
    %cst_23 = arith.constant 1.000000e+00 : f32
    %33 = vector.broadcast %cst_23 : f32 to vector<8x1xf32>
    %34 = arith.addf %33, %32 : vector<8x1xf32>
    %35 = arith.divf %33, %34 : vector<8x1xf32>
    %c0_24 = arith.constant 0 : index
    %c0_25 = arith.constant 0 : index
    %36 = vector.load %arg10[%c0_24, %c0_25] : memref<8x1xf32, #tpu.memory_space<vmem>>, vector<8x1xf32>
    tpu.vector_store %arg10[%c0_24, %c0_25], %35 {strides = array<i32>} : memref<8x1xf32, #tpu.memory_space<vmem>>, vector<8x1xf32>,
    return
  }
  func.func @transform_0(%arg0: i32) -> (i32, i32) {
    %c0_i32 = arith.constant 0 : i32
    %c0_i32_0 = arith.constant 0 : i32
    return %arg0, %c0_i32 : i32, i32
  }
  func.func @transform_1(%arg0: i32) -> (i32, i32) {
    %c0_i32 = arith.constant 0 : i32
    %c0_i32_0 = arith.constant 0 : i32
    %c0_i32_1 = arith.constant 0 : i32
    return %c0_i32, %c0_i32_0 : i32, i32
  }
  func.func @transform_2(%arg0: i32) -> (i32, i32) {
    %c0_i32 = arith.constant 0 : i32
    %c0_i32_0 = arith.constant 0 : i32
    %c0_i32_1 = arith.constant 0 : i32
    return %c0_i32, %c0_i32_0 : i32, i32
  }
  func.func @transform_3(%arg0: i32) -> (i32, i32) {
    %c0_i32 = arith.constant 0 : i32
    %c0_i32_0 = arith.constant 0 : i32
    %c0_i32_1 = arith.constant 0 : i32
    return %c0_i32, %c0_i32_0 : i32, i32
  }
  func.func @transform_4(%arg0: i32) -> (i32, i32) {
    %c0_i32 = arith.constant 0 : i32
    %c0_i32_0 = arith.constant 0 : i32
    %c0_i32_1 = arith.constant 0 : i32
    return %c0_i32, %c0_i32_0 : i32, i32
  }
  func.func @transform_5(%arg0: i32) -> (i32, i32) {
    %c0_i32 = arith.constant 0 : i32
    %c0_i32_0 = arith.constant 0 : i32
    %c0_i32_1 = arith.constant 0 : i32
    return %c0_i32, %c0_i32_0 : i32, i32
  }
  func.func @transform_6(%arg0: i32) -> (i32, i32) {
    %c0_i32 = arith.constant 0 : i32
    %c0_i32_0 = arith.constant 0 : i32
    %c0_i32_1 = arith.constant 0 : i32
    return %c0_i32, %c0_i32_0 : i32, i32
  }
  func.func @transform_7(%arg0: i32) -> (i32, i32) {
    %c0_i32 = arith.constant 0 : i32
    %c0_i32_0 = arith.constant 0 : i32
    %c0_i32_1 = arith.constant 0 : i32
    return %c0_i32, %c0_i32_0 : i32, i32
  }
  func.func @transform_8(%arg0: i32) -> (i32, i32) {
    %c0_i32 = arith.constant 0 : i32
    %c0_i32_0 = arith.constant 0 : i32
    %c0_i32_1 = arith.constant 0 : i32
    return %c0_i32, %c0_i32_0 : i32, i32
  }
  func.func @transform_9(%arg0: i32) -> (i32, i32) {
    %c0_i32 = arith.constant 0 : i32
    %c0_i32_0 = arith.constant 0 : i32
    return %arg0, %c0_i32 : i32, i32
  }
}

</mosaic_0001>

<bundles_post_ra>
// kernel: mlp_forward.1
= control target key start
LH: loop header
LB: loop body
LE: loop exit
PB: predicated region body
PF: predicated region fallthrough
CT: control target
= control target key end

     0   :  { %14 = vsyncpa [#allocation3], 0  ;;  %s1564_s0 = inlined_call_operand.vmem [shape: bf16[8,512], index: 0, kind: input, shape index: {}]   ;;  %s1565_s1 = inlined_call_operand.hbm [shape: bf16[512,256], index: 1, kind: input, shape index: {}]   ;;  %s1566_s2 = inlined_call_operand.hbm [shape: f32[1,256], index: 2, kind: input, shape index: {}]   ;;  %s1567_s3 = inlined_call_operand.vmem [shape: bf16[256,128], index: 3, kind: input, shape index: {}]   ;;  %s1568_s4 = inlined_call_operand.hbm [shape: f32[1,128], index: 4, kind: input, shape index: {}]   ;;  %s1569_s5 = inlined_call_operand.vmem [shape: bf16[128,64], index: 5, kind: input, shape index: {}]   ;;  %s1570_s6 = inlined_call_operand.vmem [shape: f32[1,64], index: 6, kind: input, shape index: {}]   ;;  %s1571_s7 = inlined_call_operand.vmem [shape: bf16[64,128], index: 7, kind: input, shape index: {}]   ;;  %s1572_s8 = inlined_call_operand.vmem [shape: f32[1,128], index: 8, kind: input, shape index: {}]   ;;  %s1573_s9 = inlined_call_operand.vmem [shape: f32[8,1], index: 9, kind: output, shape index: {}]  }
   0x1   :  { %15 = vsyncpa [#allocation5], 0  ;;  %s1339_s30 = smov [#allocation4]   ;;  %s1340_s11 = smov [#allocation2]  }
   0x2   :  { %s36_s10 = sshll.u32 %s1339_s30, 4  ;;  %s23_s12 = sshll.u32 %s1340_s11, 4  ;;  %s37_s10 = int_to_ptr.vmem [resolvable:$true] %s36_s10  ;;  %s1396_s12 = int_to_ptr.vmem [resolvable:$true] %s23_s12 }
   0x3   :  { %s1269_s15 = scalar_lea.hbm %s1566_s2, 32 }
   0x4   :  { %p1270_p0 = scmp.ne.s32.totalorder %s1566_s2, %s1269_s15  ;;  %p1273_p1 = scmp.lt.u32.totalorder %s1269_s15, %s1566_s2 }
   0x6   :  { %p1275_p2 = pnand %p1273_p1, %p1270_p0 }
   0x8   :  { %1278 = shalt.err (!%p1275_p2)
}
   0x9   :  { %s1279_s20 = scalar_lea.vmem %s37_s10, 32  ;;  %p1284_p4 = scmp.lt.s32.totalorder %s37_s10, %s37_s10 }
   0xa   :  { %p1280_p3 = scmp.ne.s32.totalorder %s37_s10, %s1279_s20  ;;  %p1285_p5 = scmp.lt.s32.totalorder %s1279_s20, %s1279_s20 }
   0xc   :  { %p1286_p6 = por %p1285_p5, %p1284_p4 }
   0xe   :  { %p1287_p7 = pnand %p1286_p6, %p1280_p3 }
  0x10   :  { %1290 = shalt.err (!%p1287_p7)
}
  0x11   :  { %39 = dma.hbm_to_vmem [thread:$0]  %s1566_s2, 32, %s37_s10, [#allocation5]  }
  0x12   :  { %s1291_s25 = scalar_lea.hbm %s1565_s1, 8192 }
  0x13   :  { %p1292_p8 = scmp.ne.s32.totalorder %s1565_s1, %s1291_s25  ;;  %p1295_p9 = scmp.lt.u32.totalorder %s1291_s25, %s1565_s1 }
  0x15   :  { %p1297_p10 = pnand %p1295_p9, %p1292_p8 }
  0x17   :  { %1300 = shalt.err (!%p1297_p10)
}
  0x18   :  { %s1301_s30 = scalar_lea.vmem %s1396_s12, 8192  ;;  %p1306_p12 = scmp.lt.s32.totalorder %s1396_s12, %s1396_s12 }
  0x19   :  { %p1302_p11 = scmp.ne.s32.totalorder %s1396_s12, %s1301_s30  ;;  %p1307_p13 = scmp.lt.s32.totalorder %s1301_s30, %s1301_s30 }
  0x1b   :  { %p1308_p0 = por %p1307_p13, %p1306_p12 }
  0x1d   :  { %p1309_p1 = pnand %p1308_p0, %p1302_p11 }
  0x1f   :  { %1312 = shalt.err (!%p1309_p1)
}
  0x20   :  { %s1341_s2 = smov 128   ;;  %s1342_s10 = smov 8  }
  0x21   :  { %29 = dma.hbm_to_vmem [thread:$0]  %s1565_s1, 8192, %s1396_s12, [#allocation3], %s1341_s2, %s1341_s2, %s1342_s10  }
  0x22   :  { %s1343_s14 = smov [#allocation6]   ;;  %s1313_s18 = scalar_lea.hbm %s1568_s4, 16 }
  0x23   :  { %s48_s15 = sshll.u32 %s1343_s14, 4  ;;  %p1314_p2 = scmp.ne.s32.totalorder %s1568_s4, %s1313_s18  ;;  %s49_s15 = int_to_ptr.vmem [resolvable:$true] %s48_s15 }
  0x24   :  { %p1317_p3 = scmp.lt.u32.totalorder %s1313_s18, %s1568_s4 }
  0x26   :  { %p1319_p4 = pnand %p1317_p3, %p1314_p2 }
  0x28   :  { %1322 = shalt.err (!%p1319_p4)
}
  0x29   :  { %s1323_s23 = scalar_lea.vmem %s49_s15, 16  ;;  %s1327_s1 = scalar_lea.vmem %s49_s15, 32 }
  0x2a   :  { %p1324_p5 = scmp.ne.s32.totalorder %s49_s15, %s1323_s23  ;;  %p1328_p6 = scmp.lt.s32.totalorder %s49_s15, %s49_s15 }
  0x2b   :  { %p1329_p7 = scmp.lt.s32.totalorder %s1327_s1, %s1323_s23 }
  0x2d   :  { %p1330_p8 = por %p1329_p7, %p1328_p6 }
  0x2f   :  { %p1331_p9 = pnand %p1330_p8, %p1324_p5 }
  0x31   :  { %1334 = shalt.err (!%p1331_p9)
}
  0x32   :  { %51 = dma.hbm_to_vmem [thread:$0]  %s1568_s4, 16, %s49_s15, [#allocation5]  }
  0x33   :  { %1335 = dma.done.wait [#allocation3], 8192  }
  0x34   :  { %1336 = vsyncadd [#allocation3], 4294959104 }
  0x35   :  { %1337 = dma.done.wait [#allocation5], 48  }
  0x36   :  { %1338 = vsyncadd [#allocation5], 4294967248  ;;  %v1137_v0 = vld [vmem:[#allocation2 + $0x4] ss:$8 sps:$4 sm:$0xff]   ;;  %v1139_v1 = vld [vmem:[#allocation2] ss:$8 sps:$4 sm:$0xff]  }
  0x37   :  { %482 = vmatprep.subr.bf16.mxu0 %v1137_v0  ;;  %v1140_v2 = vld [vmem:[#allocation2 + $0x14] ss:$8 sps:$4 sm:$0xff]   ;;  %v1142_v3 = vld [vmem:[#allocation2 + $0x10] ss:$8 sps:$4 sm:$0xff]   ;;  %v1143_v4 = vld [vmem:[#allocation2 + $0x24] ss:$8 sps:$4 sm:$0xff]  }
  0x38   :  { %483 = vmatpush1.bf16.msra.mxu0 %v1139_v1  ;;  %v1145_v5 = vld [vmem:[#allocation2 + $0x20] ss:$8 sps:$4 sm:$0xff]   ;;  %v1146_v6 = vld [vmem:[#allocation2 + $0x34] ss:$8 sps:$4 sm:$0xff]   ;;  %v1148_v7 = vld [vmem:[#allocation2 + $0x30] ss:$8 sps:$4 sm:$0xff]  }
  0x39   :  { %484 = vmatprep.subr.bf16.mxu0 %v1140_v2  ;;  %v1149_v8 = vld [vmem:[#allocation2 + $0x44] ss:$8 sps:$4 sm:$0xff]   ;;  %v1151_v9 = vld [vmem:[#allocation2 + $0x40] ss:$8 sps:$4 sm:$0xff]   ;;  %v1152_v10 = vld [vmem:[#allocation2 + $0x54] ss:$8 sps:$4 sm:$0xff]  }
  0x3a   :  { %v1154_v11 = vld [vmem:[#allocation2 + $0x50] ss:$8 sps:$4 sm:$0xff]   ;;  %v1155_v12 = vld [vmem:[#allocation2 + $0x64] ss:$8 sps:$4 sm:$0xff]   ;;  %v1157_v15 = vld [vmem:[#allocation2 + $0x60] ss:$8 sps:$4 sm:$0xff]  }
  0x3b   :  { %v1442_v13 = vld [vmem:[%s1564_s0] sm:$0xff]  ;;  %v1158_v16 = vld [vmem:[#allocation2 + $0x74] ss:$8 sps:$4 sm:$0xff]   ;;  %v1160_v17 = vld [vmem:[#allocation2 + $0x70] ss:$8 sps:$4 sm:$0xff]   ;;  %vm1345_vm0 = vmmov 0  }
  0x3c   :  { %485 = vmatpush1.bf16.msra.mxu0 %v1142_v3  ;;  %v956_v14 = vcombine.high %v1442_v13, %v1442_v13  ;;  %v1161_v18 = vld [vmem:[#allocation2 + $0x84] ss:$8 sps:$4 sm:$0xff]   ;;  %v1163_v19 = vld [vmem:[#allocation2 + $0x80] ss:$8 sps:$4 sm:$0xff]   ;;  %v1164_v20 = vld [vmem:[#allocation2 + $0x94] ss:$8 sps:$4 sm:$0xff]   ;;  %v955_v48 = vcombine.low %v1442_v13, %v1442_v13 }
  0x3d   :  { %486 = vmatprep.subr.bf16.mxu0 %v1143_v4  ;;  %v1166_v21 = vld [vmem:[#allocation2 + $0x90] ss:$8 sps:$4 sm:$0xff]   ;;  %v1167_v22 = vld [vmem:[#allocation2 + $0xa4] ss:$8 sps:$4 sm:$0xff]   ;;  %v1169_v23 = vld [vmem:[#allocation2 + $0xa0] ss:$8 sps:$4 sm:$0xff]  }
  0x3e   :  { %514 = vmatprep.mubr.bf16.mxu0 %v956_v14  ;;  %v1170_v24 = vld [vmem:[#allocation2 + $0xb4] ss:$8 sps:$4 sm:$0xff]   ;;  %v1172_v25 = vld [vmem:[#allocation2 + $0xb0] ss:$8 sps:$4 sm:$0xff]   ;;  %v1173_v26 = vld [vmem:[#allocation2 + $0xc4] ss:$8 sps:$4 sm:$0xff]  }
  0x3f   :  { %v1237_v27 = vld [vmem:[%s1567_s3 + $0x40] sm:$0xff]   ;;  %v1176_v30 = vld [vmem:[#allocation2 + $0xd4] ss:$8 sps:$4 sm:$0xff]   ;;  %v1239_v31 = vld [vmem:[%s1567_s3 + $0x48] sm:$0xff]   ;;  %vm897_vm1 = vcmask 523264   ;;  %vm947_vm2 = vcmask 7168  }
  0x40   :  { %487 = vmatpush1.bf16.msra.mxu0 %v1145_v5  ;;  %v1175_v28 = vld [vmem:[#allocation2 + $0xc0] ss:$8 sps:$4 sm:$0xff]   ;;  %1056 = vmatprep.subr.bf16.mxu1 %v1237_v27  ;;  %v1241_v33 = vld [vmem:[%s1567_s3 + $0x50] sm:$0xff]   ;;  %v1179_v35 = vld [vmem:[#allocation2 + $0xe4] ss:$8 sps:$4 sm:$0xff]  }
  0x41   :  { %488 = vmatprep.subr.bf16.mxu0 %v1146_v6  ;;  %v1238_v29 = vld [vmem:[%s1567_s3] sm:$0xff]   ;;  %v1240_v32 = vld [vmem:[%s1567_s3 + $0x8] sm:$0xff]   ;;  %v1178_v34 = vld [vmem:[#allocation2 + $0xd0] ss:$8 sps:$4 sm:$0xff]  }
  0x42   :  { %1057 = vmatpush3.bf16.msra.mxu1 %v1238_v29  ;;  %v1242_v36 = vld [vmem:[%s1567_s3 + $0x10] sm:$0xff]   ;;  %v1243_v37 = vld [vmem:[%s1567_s3 + $0x58] sm:$0xff]   ;;  %v1181_v38 = vld [vmem:[#allocation2 + $0xe0] ss:$8 sps:$4 sm:$0xff]  }
  0x43   :  { %1058 = vmatprep.subr.bf16.mxu1 %v1239_v31  ;;  %v1182_v39 = vld [vmem:[#allocation2 + $0xf4] ss:$8 sps:$4 sm:$0xff]   ;;  %v1245_v41 = vld [vmem:[%s1567_s3 + $0x60] sm:$0xff]   ;;  %v1184_v42 = vld [vmem:[#allocation2 + $0xf0] ss:$8 sps:$4 sm:$0xff]  }
  0x44   :  { %489 = vmatpush1.bf16.msra.mxu0 %v1148_v7  ;;  %v1244_v40 = vld [vmem:[%s1567_s3 + $0x18] sm:$0xff]   ;;  %v1246_v43 = vld [vmem:[%s1567_s3 + $0x20] sm:$0xff]   ;;  %v1479_v45 = vld [vmem:[%s1564_s0 + $0x8] sm:$0xff] }
  0x45   :  { %490 = vmatprep.subr.bf16.mxu0 %v1149_v8  ;;  %v1189_v44 = vld [vmem:[#allocation2 + $0x104] ss:$8 sps:$4 sm:$0xff]   ;;  %v1187_v47 = vld [vmem:[#allocation2 + $0x100] ss:$8 sps:$4 sm:$0xff]   ;;  %v1192_v49 = vld [vmem:[#allocation2 + $0x114] ss:$8 sps:$4 sm:$0xff]   ;;  %v958_v51 = vcombine.high %v1479_v45, %v1479_v45 }
  0x46   :  { %1059 = vmatpush3.bf16.msra.mxu1 %v1240_v32  ;;  %v1247_v46 = vld [vmem:[%s1567_s3 + $0x68] sm:$0xff]   ;;  %v1190_v52 = vld [vmem:[#allocation2 + $0x110] ss:$8 sps:$4 sm:$0xff]   ;;  %v1198_v55 = vld [vmem:[#allocation2 + $0x134] ss:$8 sps:$4 sm:$0xff]  }
  0x47   :  { %1060 = vmatprep.subr.bf16.mxu1 %v1241_v33  ;;  %v1248_v50 = vld [vmem:[%s1567_s3 + $0x28] sm:$0xff]   ;;  %v1196_v56 = vld [vmem:[#allocation2 + $0x130] ss:$8 sps:$4 sm:$0xff]   ;;  %v1204_v59 = vld [vmem:[#allocation2 + $0x154] ss:$8 sps:$4 sm:$0xff]  }
  0x48   :  { %491 = vmatpush1.bf16.msra.mxu0 %v1151_v9  ;;  %v1195_v53 = vld [vmem:[#allocation2 + $0x124] ss:$8 sps:$4 sm:$0xff]   ;;  %v1193_v54 = vld [vmem:[#allocation2 + $0x120] ss:$8 sps:$4 sm:$0xff]   ;;  %v1202_v60 = vld [vmem:[#allocation2 + $0x150] ss:$8 sps:$4 sm:$0xff]  }
  0x49   :  { %492 = vmatprep.subr.bf16.mxu0 %v1152_v10  ;;  %v1201_v57 = vld [vmem:[#allocation2 + $0x144] ss:$8 sps:$4 sm:$0xff]   ;;  %v1199_v58 = vld [vmem:[#allocation2 + $0x140] ss:$8 sps:$4 sm:$0xff]   ;;  %v1210_v63 = vld [vmem:[#allocation2 + $0x174] ss:$8 sps:$4 sm:$0xff]  }
  0x4a   :  { %1061 = vmatpush3.bf16.msra.mxu1 %v1242_v36  ;;  %v1207_v61 = vld [vmem:[#allocation2 + $0x164] ss:$8 sps:$4 sm:$0xff]   ;;  %v1205_v62 = vld [vmem:[#allocation2 + $0x160] ss:$8 sps:$4 sm:$0xff]   ;;  %v1208_v0 = vld [vmem:[#allocation2 + $0x170] ss:$8 sps:$4 sm:$0xff]  }
  0x4b   :  { %1062 = vmatprep.subr.bf16.mxu1 %v1243_v37  ;;  %v1213_v1 = vld [vmem:[#allocation2 + $0x184] ss:$8 sps:$4 sm:$0xff]   ;;  %v1211_v2 = vld [vmem:[#allocation2 + $0x180] ss:$8 sps:$4 sm:$0xff]   ;;  %v1216_v3 = vld [vmem:[#allocation2 + $0x194] ss:$8 sps:$4 sm:$0xff]  }
  0x4c   :  { %493 = vmatpush1.bf16.msra.mxu0 %v1154_v11  ;;  %v1214_v4 = vld [vmem:[#allocation2 + $0x190] ss:$8 sps:$4 sm:$0xff]   ;;  %v1219_v5 = vld [vmem:[#allocation2 + $0x1a4] ss:$8 sps:$4 sm:$0xff]   ;;  %v1217_v6 = vld [vmem:[#allocation2 + $0x1a0] ss:$8 sps:$4 sm:$0xff]  }
  0x4d   :  { %494 = vmatprep.subr.bf16.mxu0 %v1155_v12  ;;  %v1222_v7 = vld [vmem:[#allocation2 + $0x1b4] ss:$8 sps:$4 sm:$0xff]   ;;  %v1220_v8 = vld [vmem:[#allocation2 + $0x1b0] ss:$8 sps:$4 sm:$0xff]   ;;  %v1225_v9 = vld [vmem:[#allocation2 + $0x1c4] ss:$8 sps:$4 sm:$0xff]  }
  0x4e   :  { %1063 = vmatpush3.bf16.msra.mxu1 %v1244_v40  ;;  %v1223_v10 = vld [vmem:[#allocation2 + $0x1c0] ss:$8 sps:$4 sm:$0xff]   ;;  %v1228_v11 = vld [vmem:[#allocation2 + $0x1d4] ss:$8 sps:$4 sm:$0xff]   ;;  %v1226_v12 = vld [vmem:[#allocation2 + $0x1d0] ss:$8 sps:$4 sm:$0xff]  }
  0x4f   :  { %1064 = vmatprep.subr.bf16.mxu1 %v1245_v41  ;;  %v1231_v13 = vld [vmem:[#allocation2 + $0x1e4] ss:$8 sps:$4 sm:$0xff]   ;;  %v1229_v14 = vld [vmem:[#allocation2 + $0x1e0] ss:$8 sps:$4 sm:$0xff]  }
  0x50   :  { %495 = vmatpush1.bf16.msra.mxu0 %v1157_v15  ;;  %v1234_v15 = vld [vmem:[#allocation2 + $0x1f4] ss:$8 sps:$4 sm:$0xff]   ;;  %v1254_v41 = vld [vmem:[%s1569_s5 + $0x8] sm:$0xff]  }
  0x51   :  { %496 = vmatprep.subr.bf16.mxu0 %v1158_v16  ;;  %v1232_v16 = vld [vmem:[#allocation2 + $0x1f0] ss:$8 sps:$4 sm:$0xff]  }
  0x52   :  { %1065 = vmatpush3.bf16.msra.mxu1 %v1246_v43  ;;  %v1256_v43 = vld [vmem:[%s1569_s5 + $0x18] sm:$0xff]  }
  0x53   :  { %1066 = vmatprep.subr.bf16.mxu1 %v1247_v46  ;;  %v1259_v46 = vld [vmem:[%s1569_s5 + $0x30] sm:$0xff]  }
  0x54   :  { %497 = vmatpush1.bf16.msra.mxu0 %v1160_v17  ;;  %v957_v17 = vcombine.low %v1479_v45, %v1479_v45  ;;  %v1258_v45 = vld [vmem:[%s1569_s5 + $0x28] sm:$0xff]  }
  0x55   :  { %498 = vmatprep.subr.bf16.mxu0 %v1161_v18  ;;  %v1249_v18 = vld [vmem:[%s1567_s3 + $0x70] sm:$0xff]  }
  0x56   :  { %1067 = vmatpush3.bf16.msra.mxu1 %v1248_v50 }
  0x57   :  { %1068 = vmatprep.subr.bf16.mxu1 %v1249_v18 }
  0x58   :  { %499 = vmatpush1.bf16.msra.mxu0 %v1163_v19  ;;  %v1250_v19 = vld [vmem:[%s1567_s3 + $0x30] sm:$0xff]  }
  0x59   :  { %500 = vmatprep.subr.bf16.mxu0 %v1164_v20  ;;  %v1251_v20 = vld [vmem:[%s1567_s3 + $0x78] sm:$0xff]  }
  0x5a   :  { %1069 = vmatpush3.bf16.msra.mxu1 %v1250_v19 }
  0x5b   :  { %1070 = vmatprep.subr.bf16.mxu1 %v1251_v20 }
  0x5c   :  { %501 = vmatpush1.bf16.msra.mxu0 %v1166_v21  ;;  %v1252_v21 = vld [vmem:[%s1567_s3 + $0x38] sm:$0xff]  }
  0x5d   :  { %502 = vmatprep.subr.bf16.mxu0 %v1167_v22  ;;  %v1344_v22 = vmov 0.0  }
  0x5e   :  { %1071 = vmatpush3.bf16.msra.mxu1 %v1252_v21 }
  0x5f   :  { %1092 = vmatprep.subr.bf16.mxu1 %v1344_v22 }
  0x60   :  { %503 = vmatpush1.bf16.msra.mxu0 %v1169_v23  ;;  %v138_v23 = vlaneseq }
  0x61   :  { %504 = vmatprep.subr.bf16.mxu0 %v1170_v24 }
  0x62   :  { %v139_v24 = vshrl.u32 %v138_v23, 7 }
  0x64   :  { %505 = vmatpush1.bf16.msra.mxu0 %v1172_v25  ;;  %v140_v25 = vsub.s32 0, %v139_v24  ;;  %v144_v27 = vsub.s32 1, %v139_v24 }
  0x65   :  { %506 = vmatprep.subr.bf16.mxu0 %v1173_v26  ;;  %v136_v26 = vld [vmem:[#allocation4] sm:$0x3] }
  0x66   :  { %v145_v29 = vrot.slane %v136_v26, %v144_v27 }
  0x68   :  { %507 = vmatpush1.bf16.msra.mxu0 %v1175_v28  ;;  %v141_v28 = vrot.slane %v136_v26, %v140_v25 }
  0x69   :  { %508 = vmatprep.subr.bf16.mxu0 %v1176_v30 }
  0x6c   :  { %509 = vmatpush1.bf16.msra.mxu0 %v1178_v34 }
  0x6d   :  { %510 = vmatprep.subr.bf16.mxu0 %v1179_v35 }
  0x70   :  { %511 = vmatpush1.bf16.msra.mxu0 %v1181_v38 }
  0x71   :  { %512 = vmatprep.subr.bf16.mxu0 %v1182_v39  ;;  %v1253_v39 = vld [vmem:[%s1569_s5] sm:$0xff]  }
  0x74   :  { %513 = vmatpush1.bf16.msra.mxu0 %v1184_v42  ;;  %v1255_v42 = vld [vmem:[%s1569_s5 + $0x10] sm:$0xff]  }
  0x75   :  { %523 = vmatprep.subr.bf16.mxu0 %v1189_v44  ;;  %v1257_v44 = vld [vmem:[%s1569_s5 + $0x20] sm:$0xff]  }
  0x77   :  { %515 = vmatmul.mubr.bf16.vlgmr.msra.gmra.mrb[0].mxu0 %v955_v48 }
  0x78   :  { %524 = vmatpush1.bf16.msra.mxu0 %v1187_v47  ;;  %555 = vmatprep.mubr.bf16.mxu0 %v958_v51  ;;  %v1260_v47 = vld [vmem:[%s1569_s5 + $0x38] sm:$0xff]  }
  0x79   :  { %525 = vmatprep.subr.bf16.mxu0 %v1192_v49  ;;  %v1023_v49 = vld [vmem:[#allocation6] ss:$0 sm:$0xff] }
  0x7c   :  { %526 = vmatpush1.bf16.msra.mxu0 %v1190_v52 }
  0x7d   :  { %527 = vmatprep.subr.bf16.mxu0 %v1195_v53 }
  0x80   :  { %528 = vmatpush1.bf16.msra.mxu0 %v1193_v54 }
  0x81   :  { %529 = vmatprep.subr.bf16.mxu0 %v1198_v55 }
  0x84   :  { %530 = vmatpush1.bf16.msra.mxu0 %v1196_v56  ;;  %v1261_v56 = vld [vmem:[%s1571_s7] sm:$0xff]  }
  0x85   :  { %531 = vmatprep.subr.bf16.mxu0 %v1201_v57 }
  0x88   :  { %532 = vmatpush1.bf16.msra.mxu0 %v1199_v58  ;;  %v1262_v58 = vld [vmem:[%s1571_s7 + $0x8] sm:$0xff]  }
  0x89   :  { %533 = vmatprep.subr.bf16.mxu0 %v1204_v59  ;;  %v1263_v59 = vld [vmem:[%s1571_s7 + $0x10] sm:$0xff]  }
  0x8c   :  { %534 = vmatpush1.bf16.msra.mxu0 %v1202_v60  ;;  %v1264_v60 = vld [vmem:[%s1571_s7 + $0x18] sm:$0xff]  }
  0x8d   :  { %535 = vmatprep.subr.bf16.mxu0 %v1207_v61  ;;  %v1040_v61 = vld [vmem:[%s1570_s6] ss:$0 sm:$0xff] }
  0x90   :  { %536 = vmatpush1.bf16.msra.mxu0 %v1205_v62 }
  0x91   :  { %537 = vmatprep.subr.bf16.mxu0 %v1210_v63 }
  0x94   :  { %538 = vmatpush1.bf16.msra.mxu0 %v1208_v0 }
  0x95   :  { %539 = vmatprep.subr.bf16.mxu0 %v1213_v1 }
  0x98   :  { %540 = vmatpush1.bf16.msra.mxu0 %v1211_v2 }
  0x99   :  { %541 = vmatprep.subr.bf16.mxu0 %v1216_v3 }
  0x9c   :  { %542 = vmatpush1.bf16.msra.mxu0 %v1214_v4 }
  0x9d   :  { %543 = vmatprep.subr.bf16.mxu0 %v1219_v5  ;;  %v1049_v5 = vld [vmem:[%s1572_s8] ss:$0 sm:$0xff] }
  0xa0   :  { %544 = vmatpush1.bf16.msra.mxu0 %v1217_v6 }
  0xa1   :  { %545 = vmatprep.subr.bf16.mxu0 %v1222_v7 }
  0xa4   :  { %546 = vmatpush1.bf16.msra.mxu0 %v1220_v8 }
  0xa5   :  { %547 = vmatprep.subr.bf16.mxu0 %v1225_v9 }
  0xa8   :  { %548 = vmatpush1.bf16.msra.mxu0 %v1223_v10 }
  0xa9   :  { %549 = vmatprep.subr.bf16.mxu0 %v1228_v11 }
  0xac   :  { %550 = vmatpush1.bf16.msra.mxu0 %v1226_v12 }
  0xad   :  { %551 = vmatprep.subr.bf16.mxu0 %v1231_v13 }
  0xb0   :  { %552 = vmatpush1.bf16.msra.mxu0 %v1229_v14 }
  0xb1   :  { %553 = vmatprep.subr.bf16.mxu0 %v1234_v15 }
  0xb4   :  { %554 = vmatpush1.bf16.msra.mxu0 %v1232_v16 }
  0xb7   :  { %556 = vmatmul.mubr.bf16.vlgmr.msra.gmra.mrb[0].mxu0 %v957_v17 }
 0x18a   :  { %v557_v30 = vpop.f32.mrb[0].mxu0 }
 0x18b   :  { %v1124_v31 = vadd.f32 %v557_v30, %v141_v28  ;;  %v559_v32 = vpop.f32.mrb[1].mxu0 }
 0x18c   :  { %v1125_v33 = vadd.f32 %v559_v32, %v145_v29  ;;  %v561_v34 = vpop.f32.mrb[2].mxu0 }
 0x18d   :  { %v564_v35 = vmax.f32 %v1124_v31, 0.0  ;;  %v562_v36 = vpop.f32.mrb[3].mxu0 }
 0x18e   :  { %v565_v37 = vmax.f32 %v1125_v33, 0.0 }
 0x18f   :  { %v566_v40 = vpack.c.bf16 %v564_v35, %v564_v35 }
 0x190   :  { %v567_v38 = vpack.c.bf16 %v565_v37, %v565_v37 }
 0x192   :  { %735 = vmatprep.mubr.bf16.mxu1 %v567_v38 }
 0x193   :  { %736 = vmatmul.mubr.bf16.vlgmr.msra.gmra.mrb[0].mxu1 %v566_v40 }
 0x194   :  { %1093 = vmatpush3.bf16.msra.mxu1 %v1253_v39  ;;  %1108 = vmatprep.mubr.msk.bf16.mxu1 %vm1345_vm0, %v1344_v22 }
 0x195   :  { %1094 = vmatprep.subr.bf16.mxu1 %v1344_v22 }
 0x198   :  { %1095 = vmatpush3.bf16.msra.mxu1 %v1254_v41 }
 0x199   :  { %1096 = vmatprep.subr.bf16.mxu1 %v1344_v22 }
 0x19c   :  { %1097 = vmatpush3.bf16.msra.mxu1 %v1255_v42 }
 0x19d   :  { %1098 = vmatprep.subr.bf16.mxu1 %v1344_v22 }
 0x1a0   :  { %1099 = vmatpush3.bf16.msra.mxu1 %v1256_v43 }
 0x1a1   :  { %1100 = vmatprep.subr.bf16.mxu1 %v1344_v22 }
 0x1a4   :  { %1101 = vmatpush3.bf16.msra.mxu1 %v1257_v44 }
 0x1a5   :  { %1102 = vmatprep.subr.bf16.mxu1 %v1344_v22 }
 0x1a8   :  { %1103 = vmatpush3.bf16.msra.mxu1 %v1258_v45 }
 0x1a9   :  { %1104 = vmatprep.subr.bf16.mxu1 %v1344_v22 }
 0x1ac   :  { %1105 = vmatpush3.bf16.msra.mxu1 %v1259_v46 }
 0x1ad   :  { %1106 = vmatprep.subr.bf16.mxu1 %v1344_v22 }
 0x1b0   :  { %1107 = vmatpush3.bf16.msra.mxu1 %v1260_v47 }
 0x1b1   :  { %1112 = vmatprep.subr.bf16.mxu1 %v1344_v22 }
 0x266   :  { %v1072_v48 = vpop.f32.mrb[0].mxu1 }
 0x267   :  { %v1073_v50 = vpop.f32.mrb[1].mxu1 }
 0x268   :  { %v1074_v51 = vadd.f32 %v1073_v50, %v1072_v48  ;;  %v1075_v52 = vpop.f32.mrb[2].mxu1 }
 0x269   :  { %v1076_v53 = vpop.f32.mrb[3].mxu1 }
 0x26a   :  { %v738_v54 = vadd.f32 %v1074_v51, %v1023_v49 }
 0x26c   :  { %v743_v55 = vmax.f32 %v738_v54, 0.0 }
 0x26e   :  { %v744_v57 = vpack.c.bf16 %v743_v55, %v743_v55 }
 0x270   :  { %1109 = vmatmul.mubr.bf16.vlgmr.msra.gmra.mrb[4].mxu1 %v744_v57 }
 0x271   :  { %1113 = vmatpush3.bf16.msra.mxu1 %v1261_v56  ;;  %1120 = vmatprep.mubr.msk.bf16.mxu1 %vm1345_vm0, %v1344_v22 }
 0x272   :  { %1114 = vmatprep.subr.bf16.mxu1 %v1344_v22 }
 0x275   :  { %1115 = vmatpush3.bf16.msra.mxu1 %v1262_v58 }
 0x276   :  { %1116 = vmatprep.subr.bf16.mxu1 %v1344_v22 }
 0x279   :  { %1117 = vmatpush3.bf16.msra.mxu1 %v1263_v59 }
 0x27a   :  { %1118 = vmatprep.subr.bf16.mxu1 %v1344_v22 }
 0x27d   :  { %1119 = vmatpush3.bf16.msra.mxu1 %v1264_v60 }
 0x343   :  { %v850_v62 = vpop.f32.mrb[4].mxu1 }
 0x344   :  { %v851_v63 = vadd.f32 %v1040_v61, %v850_v62  ;;  %v1110_v0 = vpop.f32.mrb[5].mxu1 }
 0x345   :  { %v853_v1 = vpop.f32.mrb[6].mxu1 }
 0x346   :  { %v856_v2 = vmax.f32 %v851_v63, 0.0  ;;  %v1111_v3 = vpop.f32.mrb[7].mxu1 }
 0x348   :  { %v857_v4 = vpack.c.bf16 %v856_v2, %v856_v2 }
 0x34a   :  { %1121 = vmatmul.mubr.msk.bf16.vlgmr.msra.gmra.mrb[8].mxu1 %vm897_vm1, %v857_v4 }
 0x41d   :  { %v935_v6 = vpop.f32.mrb[8].mxu1 }
 0x41e   :  { %v936_v7 = vadd.f32 %v1049_v5, %v935_v6  ;;  %v1122_v8 = vpop.f32.mrb[9].mxu1 }
 0x41f   :  { %v938_v9 = vpop.f32.mrb[10].mxu1 }
 0x420   :  { %v1055_v10 = vmul.f32 -1.442695, %v936_v7  ;;  %v1123_v11 = vpop.f32.mrb[11].mxu1 }
 0x422   :  { %1265 = vpow2.f32 %v1055_v10 }
 0x42c   :  { %v1266_v12 = vpop.eup %1265 }
 0x42d   :  { %v944_v13 = vadd.f32 1.0, %v1266_v12 }
 0x42f   :  { %1267 = vrcp.f32 %v944_v13 }
 0x439   :  { %v1268_v14 = vpop.eup %1267 }
 0x43a   :  { %948 = vst.msk [vmem:[%s1573_s9] sm:$0xff] %vm947_vm2, %v1268_v14 }
 0x43b   :  { %953 = vsyncpa [#allocation3], 1 }
 0x43c   :  { %954 = vsyncpa [#allocation5], 1 }

</bundles_post_ra>
